<compile_context>
chip_gen: v7x
topology: tpu7x:2x2x1
jax: 0.10.0
libtpu: 0.0.40
codegen_flags: <defaults>
</compile_context>

<pallas_src>
import functools
from typing import NamedTuple

import jax
import jax.numpy as jnp
from jax.experimental import pallas as pl
from jax.experimental.pallas import tpu as pltpu


def _round_up(x, m):
    return ((x + m - 1) // m) * m


def _pick_batch_tiling(batch, max_tile=1024):
    """(padded_batch, tile): tile is a multiple of 8, divides padded_batch,
    and grid steps are few (per-step overhead ~0.35us dominates tiny tiles)."""
    bpad = _round_up(batch, 8)
    if bpad <= max_tile:
        return bpad, bpad                    # single grid step over the batch
    t = _round_up(max_tile, 8)
    while t >= 8:
        if bpad % t == 0:
            break
        t -= 8
    if t >= 128:                             # good divisor found
        return bpad, t
    tile = _round_up(max_tile, 8)            # awkward size: pad up instead of
    return _round_up(bpad, tile), tile       # shrinking the tile


class PreppedActorParams(NamedTuple):
    """Padded / packed parameters (built once by prepare_params)."""
    w1: jax.Array    # (P, input_dim, hidden_pad)
    w2: jax.Array    # (P, hidden_pad, hidden_pad)
    w3: jax.Array    # (P, hidden_pad, output_dim)
    bias: jax.Array  # (P, 3, hidden_pad): rows b1, b2, b3 (zero-padded)
    std: jax.Array   # (P, 1, output_dim) = exp(logstd) + 1e-6


def prepare_params(params):
    """One-time pad/pack of actor params (hoisted out of the forward pass).

    params: a single (w1, b1, w2, b2, w3, b3, logstd) tuple, or a sequence of
    such tuples (one per SVPG particle).  Weights are (in_dim, out_dim),
    biases (1, out_dim), logstd (1, output_dim).
    """
    if hasattr(params[0], "shape"):          # single particle
        params = [params]
    f32 = jnp.float32
    w1_0 = params[0][0]
    input_dim, hidden = w1_0.shape
    out_dim = params[0][4].shape[1]
    hp = _round_up(hidden, 128)

    w1s, w2s, w3s, bs, stds = [], [], [], [], []
    for (w1, b1, w2, b2, w3, b3, logstd) in params:
        w1s.append(jnp.pad(w1.astype(f32), ((0, 0), (0, hp - hidden))))
        w2s.append(jnp.pad(w2.astype(f32), ((0, hp - hidden), (0, hp - hidden))))
        w3s.append(jnp.pad(w3.astype(f32), ((0, hp - hidden), (0, 0))))
        b = jnp.zeros((3, hp), f32)
        b = b.at[0, :hidden].set(b1.reshape(-1).astype(f32))
        b = b.at[1, :hidden].set(b2.reshape(-1).astype(f32))
        b = b.at[2, :out_dim].set(b3.reshape(-1).astype(f32))
        bs.append(b)
        stds.append(jnp.exp(logstd.astype(f32)) + 1e-6)

    return PreppedActorParams(
        w1=jnp.stack(w1s), w2=jnp.stack(w2s), w3=jnp.stack(w3s),
        bias=jnp.stack(bs), std=jnp.stack(stds))


def actor_kernel(x_ref, w1_ref, w2_ref, w3_ref, b_ref, mean_ref, *, out_dim):
    x = x_ref[...]                      # (tile_b, input_dim)
    b = b_ref[...]                      # (3, hidden_pad) packed biases
    # Layer 1: Linear + Tanh (lane-dense, MXU + EUP)
    h1 = jnp.tanh(
        jnp.dot(x, w1_ref[...], preferred_element_type=jnp.float32)
        + b[0:1, :])
    # Layer 2: Linear + Tanh
    h2 = jnp.tanh(
        jnp.dot(h1, w2_ref[...], preferred_element_type=jnp.float32)
        + b[1:2, :])
    # Layer 3: Linear -> mean of the Normal distribution (unpadded writeback).
    mean = (jnp.dot(h2, w3_ref[...], preferred_element_type=jnp.float32)
            + b[2:3, :out_dim])
    mean_ref[...] = mean.astype(mean_ref.dtype)


def svpg_particle_actor_forward(x, prepped, *, max_tile_b=1024):
    """Forward pass of the SVPG particle actor(s).

    x: (batch, input_dim) for a single actor, or (P, batch, input_dim) with
       one state batch per particle.
    prepped: PreppedActorParams from prepare_params().
    Returns (mean, std): mean (batch, out_dim) / (P, batch, out_dim);
    std (1, out_dim) / (P, 1, out_dim) — left unbroadcast, exactly like
    torch.distributions.Normal broadcasts its (1, out_dim) scale.
    """
    squeeze_p = (x.ndim == 2)
    if squeeze_p:
        x = x[None]
    P, batch, input_dim = x.shape
    assert prepped.w1.shape[0] == P and prepped.w1.shape[1] == input_dim
    hp = prepped.w1.shape[2]
    out_dim = prepped.w3.shape[2]

    bpad, tile_b = _pick_batch_tiling(batch, max_tile_b)
    nb = bpad // tile_b
    f32 = jnp.float32

    xp = x.astype(f32)
    if bpad != batch:
        xp = jnp.pad(xp, ((0, 0), (0, bpad - batch), (0, 0)))

    cost = pl.CostEstimate(
        flops=2 * P * bpad * (input_dim * hp + hp * hp + hp * out_dim),
        transcendentals=2 * P * bpad * hp,
        bytes_accessed=4 * (P * bpad * input_dim
                            + P * (input_dim * hp + hp * hp + hp * out_dim
                                   + 3 * hp)
                            + P * bpad * out_dim),
    )

    mean = pl.pallas_call(
        functools.partial(actor_kernel, out_dim=out_dim),
        out_shape=jax.ShapeDtypeStruct((P, bpad, out_dim), f32),
        grid_spec=pltpu.PrefetchScalarGridSpec(
            num_scalar_prefetch=0,
            grid=(P, nb),
            in_specs=[
                # x tile: changes with both grid axes.
                pl.BlockSpec((None, tile_b, input_dim), lambda p, i: (p, i, 0)),
                # per-particle weights / packed biases: constant along the
                # batch axis -> DMA'd once per particle, resident in VMEM.
                pl.BlockSpec((None, input_dim, hp), lambda p, i: (p, 0, 0)),
                pl.BlockSpec((None, hp, hp), lambda p, i: (p, 0, 0)),
                pl.BlockSpec((None, hp, out_dim), lambda p, i: (p, 0, 0)),
                pl.BlockSpec((None, 3, hp), lambda p, i: (p, 0, 0)),
            ],
            out_specs=pl.BlockSpec((None, tile_b, out_dim),
                                   lambda p, i: (p, i, 0)),
        ),
        compiler_params=pltpu.CompilerParams(
            dimension_semantics=("parallel", "arbitrary")),
        cost_estimate=cost,
    )(xp, prepped.w1, prepped.w2, prepped.w3, prepped.bias)

    if bpad != batch:
        mean = mean[:, :batch, :]
    std = prepped.std
    if squeeze_p:
        mean = mean[0]
        std = std[0]
    return mean, std
    # TODO(synk): the torch.distributions.Normal object itself is not
    # materialized; callers sample / take log_prob from (mean, std) directly.


def init_params(key, input_dim, hidden_dim, output_dim):
    """Deterministic init matching PyTorch nn.Linear default (U(-k, k),
    k = 1/sqrt(fan_in)).  Weights stored as (in_dim, out_dim); biases as
    (1, out_dim); logstd = zeros - 1 as in the module."""
    ks = jax.random.split(key, 6)

    def lin(kw, kb, fan_in, fan_out):
        bound = 1.0 / jnp.sqrt(jnp.float32(fan_in))
        w = jax.random.uniform(kw, (fan_in, fan_out), jnp.float32, -bound, bound)
        b = jax.random.uniform(kb, (1, fan_out), jnp.float32, -bound, bound)
        return w, b

    w1, b1 = lin(ks[0], ks[1], input_dim, hidden_dim)
    w2, b2 = lin(ks[2], ks[3], hidden_dim, hidden_dim)
    w3, b3 = lin(ks[4], ks[5], hidden_dim, output_dim)
    logstd = jnp.zeros((1, output_dim), jnp.float32) - 1.0
    return (w1, b1, w2, b2, w3, b3, logstd)


if __name__ == "__main__":
    # Small SVPG-actor-sized dims; P particles fused into one launch, with a
    # rollout batch of states per particle.
    P, batch, input_dim, hidden_dim, output_dim = 4, 128, 16, 32, 8

    key = jax.random.PRNGKey(0)
    keys = jax.random.split(key, P + 1)
    x = jax.random.normal(keys[0], (P, batch, input_dim), jnp.float32)
    particle_params = [
        init_params(keys[1 + p], input_dim, hidden_dim, output_dim)
        for p in range(P)
    ]

    # One-time pad/pack (hoisted out of the per-call wrapper).
    prepped = prepare_params(particle_params)

    fwd = jax.jit(svpg_particle_actor_forward)
    mean, std = fwd(x, prepped)
    jax.block_until_ready((mean, std))

    # Single-actor path (matches the PyTorch module's forward exactly).
    prepped0 = prepare_params(particle_params[0])
    mean0, std0 = fwd(x[0], prepped0)
    jax.block_until_ready((mean0, std0))

    # Pure-JAX reference check of the forward semantics.
    for p in range(P):
        w1, b1, w2, b2, w3, b3, logstd = particle_params[p]
        h1 = jnp.tanh(x[p] @ w1 + b1)
        h2 = jnp.tanh(h1 @ w2 + b2)
        mean_ref = h2 @ w3 + b3
        std_ref = jnp.exp(logstd) + 1e-6
        assert mean[p].shape == mean_ref.shape and std[p].shape == std_ref.shape
        assert jnp.allclose(mean[p], mean_ref, atol=2e-5, rtol=2e-5)
        assert jnp.allclose(std[p], std_ref, atol=1e-6, rtol=1e-6)
        if p == 0:
            assert mean0.shape == mean_ref.shape and std0.shape == std_ref.shape
            assert jnp.allclose(mean0, mean_ref, atol=2e-5, rtol=2e-5)
            assert jnp.allclose(std0, std_ref, atol=1e-6, rtol=1e-6)

    print("KERNEL_OK")
</pallas_src>

<mosaic_0001>
module attributes {stable_mosaic.version = 11 : i64} {
  func.func @actor_kernel(%arg0: i32, %arg1: i32, %arg2: memref<1x128x16xf32, #tpu.memory_space<vmem>>, %arg3: memref<1x16x128xf32, #tpu.memory_space<vmem>>, %arg4: memref<1x128x128xf32, #tpu.memory_space<vmem>>, %arg5: memref<1x128x8xf32, #tpu.memory_space<vmem>>, %arg6: memref<1x3x128xf32, #tpu.memory_space<vmem>>, %arg7: memref<1x128x8xf32, #tpu.memory_space<vmem>>) attributes {dimension_semantics = [#tpu.dimension_semantics<parallel>, #tpu.dimension_semantics<arbitrary>], iteration_bounds = array<i64: 4, 1>, scalar_prefetch = 0 : i64, scratch_operands = 0 : i64, tpu.core_type = #tpu.core_type<tc>, window_params = [{transform_indices = @transform_0, window_bounds = array<i64: 1, 128, 16>}, {transform_indices = @transform_1, window_bounds = array<i64: 1, 16, 128>}, {transform_indices = @transform_2, window_bounds = array<i64: 1, 128, 128>}, {transform_indices = @transform_3, window_bounds = array<i64: 1, 128, 8>}, {transform_indices = @transform_4, window_bounds = array<i64: 1, 3, 128>}, {transform_indices = @transform_5, window_bounds = array<i64: 1, 128, 8>}]} {
    %c0 = arith.constant 0 : index
    %c0_0 = arith.constant 0 : index
    %c0_1 = arith.constant 0 : index
    %0 = vector.load %arg2[%c0, %c0_0, %c0_1] : memref<1x128x16xf32, #tpu.memory_space<vmem>>, vector<1x128x16xf32>
    %1 = vector.shape_cast %0 : vector<1x128x16xf32> to vector<128x16xf32>
    %c0_2 = arith.constant 0 : index
    %c0_3 = arith.constant 0 : index
    %c0_4 = arith.constant 0 : index
    %2 = vector.load %arg6[%c0_2, %c0_3, %c0_4] : memref<1x3x128xf32, #tpu.memory_space<vmem>>, vector<1x3x128xf32>
    %3 = vector.shape_cast %2 : vector<1x3x128xf32> to vector<3x128xf32>
    %c0_5 = arith.constant 0 : index
    %c0_6 = arith.constant 0 : index
    %c0_7 = arith.constant 0 : index
    %4 = vector.load %arg3[%c0_5, %c0_6, %c0_7] : memref<1x16x128xf32, #tpu.memory_space<vmem>>, vector<1x16x128xf32>
    %5 = vector.shape_cast %4 : vector<1x16x128xf32> to vector<16x128xf32>
    %cst = arith.constant dense<0.000000e+00> : vector<128x128xf32>
    %6 = tpu.matmul %1, %5, %cst {dimension_numbers = #tpu.dot_dimension_numbers<[1], [0], [0], [1], [0, 0, 1, 1], [], []>} : vector<128x16xf32>, vector<16x128xf32>, vector<128x128xf32> -> vector<128x128xf32>
    %7 = vector.extract_strided_slice %3 {offsets = [0, 0], sizes = [1, 128], strides = [1, 1]} : vector<3x128xf32> to vector<1x128xf32>
    %8 = vector.broadcast %7 : vector<1x128xf32> to vector<128x128xf32>
    %9 = arith.addf %6, %8 : vector<128x128xf32>
    %10 = math.tanh %9 : vector<128x128xf32>
    %c0_8 = arith.constant 0 : index
    %c0_9 = arith.constant 0 : index
    %c0_10 = arith.constant 0 : index
    %11 = vector.load %arg4[%c0_8, %c0_9, %c0_10] : memref<1x128x128xf32, #tpu.memory_space<vmem>>, vector<1x128x128xf32>
    %12 = vector.shape_cast %11 : vector<1x128x128xf32> to vector<128x128xf32>
    %cst_11 = arith.constant dense<0.000000e+00> : vector<128x128xf32>
    %13 = tpu.matmul %10, %12, %cst_11 {dimension_numbers = #tpu.dot_dimension_numbers<[1], [0], [0], [1], [0, 0, 1, 1], [], []>} : vector<128x128xf32>, vector<128x128xf32>, vector<128x128xf32> -> vector<128x128xf32>
    %14 = vector.extract_strided_slice %3 {offsets = [1, 0], sizes = [1, 128], strides = [1, 1]} : vector<3x128xf32> to vector<1x128xf32>
    %15 = vector.broadcast %14 : vector<1x128xf32> to vector<128x128xf32>
    %16 = arith.addf %13, %15 : vector<128x128xf32>
    %17 = math.tanh %16 : vector<128x128xf32>
    %c0_12 = arith.constant 0 : index
    %c0_13 = arith.constant 0 : index
    %c0_14 = arith.constant 0 : index
    %18 = vector.load %arg5[%c0_12, %c0_13, %c0_14] : memref<1x128x8xf32, #tpu.memory_space<vmem>>, vector<1x128x8xf32>
    %19 = vector.shape_cast %18 : vector<1x128x8xf32> to vector<128x8xf32>
    %cst_15 = arith.constant dense<0.000000e+00> : vector<128x8xf32>
    %20 = tpu.matmul %17, %19, %cst_15 {dimension_numbers = #tpu.dot_dimension_numbers<[1], [0], [0], [1], [0, 0, 1, 1], [], []>} : vector<128x128xf32>, vector<128x8xf32>, vector<128x8xf32> -> vector<128x8xf32>
    %21 = vector.extract_strided_slice %3 {offsets = [2, 0], sizes = [1, 8], strides = [1, 1]} : vector<3x128xf32> to vector<1x8xf32>
    %22 = vector.broadcast %21 : vector<1x8xf32> to vector<128x8xf32>
    %23 = arith.addf %20, %22 : vector<128x8xf32>
    %c0_16 = arith.constant 0 : index
    %c0_17 = arith.constant 0 : index
    %c0_18 = arith.constant 0 : index
    %24 = vector.load %arg7[%c0_16, %c0_17, %c0_18] : memref<1x128x8xf32, #tpu.memory_space<vmem>>, vector<1x128x8xf32>
    %25 = vector.shape_cast %24 : vector<1x128x8xf32> to vector<128x8xf32>
    %26 = vector.shape_cast %23 : vector<128x8xf32> to vector<1x128x8xf32>
    tpu.vector_store %arg7[%c0_16, %c0_17, %c0_18], %26 {strides = array<i32>} : memref<1x128x8xf32, #tpu.memory_space<vmem>>, vector<1x128x8xf32>,
    return
  }
  func.func @transform_0(%arg0: i32, %arg1: i32) -> (i32, i32, i32) {
    %c0_i32 = arith.constant 0 : i32
    %c0_i32_0 = arith.constant 0 : i32
    return %arg0, %arg1, %c0_i32 : i32, i32, i32
  }
  func.func @transform_1(%arg0: i32, %arg1: i32) -> (i32, i32, i32) {
    %c0_i32 = arith.constant 0 : i32
    %c0_i32_0 = arith.constant 0 : i32
    %c0_i32_1 = arith.constant 0 : i32
    return %arg0, %c0_i32, %c0_i32_0 : i32, i32, i32
  }
  func.func @transform_2(%arg0: i32, %arg1: i32) -> (i32, i32, i32) {
    %c0_i32 = arith.constant 0 : i32
    %c0_i32_0 = arith.constant 0 : i32
    %c0_i32_1 = arith.constant 0 : i32
    return %arg0, %c0_i32, %c0_i32_0 : i32, i32, i32
  }
  func.func @transform_3(%arg0: i32, %arg1: i32) -> (i32, i32, i32) {
    %c0_i32 = arith.constant 0 : i32
    %c0_i32_0 = arith.constant 0 : i32
    %c0_i32_1 = arith.constant 0 : i32
    return %arg0, %c0_i32, %c0_i32_0 : i32, i32, i32
  }
  func.func @transform_4(%arg0: i32, %arg1: i32) -> (i32, i32, i32) {
    %c0_i32 = arith.constant 0 : i32
    %c0_i32_0 = arith.constant 0 : i32
    %c0_i32_1 = arith.constant 0 : i32
    return %arg0, %c0_i32, %c0_i32_0 : i32, i32, i32
  }
  func.func @transform_5(%arg0: i32, %arg1: i32) -> (i32, i32, i32) {
    %c0_i32 = arith.constant 0 : i32
    %c0_i32_0 = arith.constant 0 : i32
    return %arg0, %arg1, %c0_i32 : i32, i32, i32
  }
}

</mosaic_0001>

<bundles_post_ra>
// kernel: svpg_particle_actor_forward.1
= control target key start
LH: loop header
LB: loop body
LE: loop exit
PB: predicated region body
PF: predicated region fallthrough
CT: control target
= control target key end

     0   :  { %s1543_s18 = smov 0   ;;  %s1545_s19 = smov 0   ;;  %s1762_s0 = inlined_call_operand.vmem [shape: f32[4,128,16], index: 0, kind: input, shape index: {}]   ;;  %s1763_s1 = inlined_call_operand.vmem [shape: f32[4,16,128], index: 1, kind: input, shape index: {}]   ;;  %s1764_s2 = inlined_call_operand.vmem [shape: f32[4,128,128], index: 2, kind: input, shape index: {}]   ;;  %s1765_s3 = inlined_call_operand.vmem [shape: f32[4,128,8], index: 3, kind: input, shape index: {}]   ;;  %s1766_s4 = inlined_call_operand.vmem [shape: f32[4,3,128], index: 4, kind: input, shape index: {}]   ;;  %s1767_s5 = inlined_call_operand.vmem [shape: f32[4,128,8], index: 5, kind: output, shape index: {}]  }
   0x1   :  { %s1547_s20 = smov 0  }
   0x2 LB: > { %s27_s21 = sadd.s32 1, %s1507_s19  ;;  %p1076_p0 = scmp.ge.s32.totalorder %s1511_s20, 1  ;;  %s1511_s20 = sphi %s1547_s20, %s15_s20   ;;  %s1507_s19 = sphi %s1545_s19, %s1769_s19   ;;  %s1503_s18 = sphi %s1543_s18, %s1768_s18  }
   0x3   : > { %p29_p1 = scmp.ge.s32.totalorder %s27_s21, 4  ;;  %p247_p2 = scmp.lt.s32.totalorder %s1511_s20, 5 }
   0x5   : > { %s1771_s21 = smov (%p29_p1, %s27_s21), 0  ;;  %p248_p3 = pnand %p1076_p0, %p247_p2 }
   0x6   : > { %p303_p4 = scmp.lt.s32.totalorder (!%p248_p3), %s1503_s18, 3  ;;  %v360_v0 = vlaneseq (!%p248_p3)  ;;  %vm364_vm0 = vcmask (!%p248_p3), 130048   ;;  %vm920_vm1 = vcmask (!%p248_p3), 64512  }
   0x7   : > { %251 = sbr.rel (%p248_p3) target bundleno = 722 (0x2d2), region = 40 }
   0x8   : > { %v1563_v1 = vshrl.u32 (!%p248_p3), %v360_v0, 7 }
   0xa   : > { %v592_v4 = vsub.s32 (!%p248_p3), 1, %v1563_v1  ;;  %v773_v5 = vsub.s32 (!%p248_p3), 2, %v1563_v1 }
   0xe   : > { %s1773_s18 = smov (!%p303_p4, %s1503_s18), 3 }
   0xf   : > { %s1561_s22 = sshll.u32 %s1773_s18, 7  ;;  %s1107_s23 = sshll.u32 %s1773_s18, 4 }
  0x10   : > { %s1569_s26 = scalar_lea.vmem %s1762_s0, %s1561_s22  ;;  %s316_s29 = scalar_lea.vmem %s1763_s1, %s1107_s23 }
  0x11   : > { %v358_v2 = vld [vmem:[%s316_s29] sm:$0xff]  ;;  %v359_v3 = vld [vmem:[%s316_s29 + $0x8] sm:$0xff]  ;;  %s1085_s30 = sshll.u32 %s1773_s18, 2  ;;  %s1585_s11 = scalar_lea.vmem %s1764_s2, %s1561_s22  ;;  %v343_v12 = vld [vmem:[%s1569_s26 + $0x10] sm:$0xff] }
  0x12   : > { %v341_v6 = vld [vmem:[%s1569_s26] sm:$0xff]  ;;  %v1333_v7 = vpack.c.bf16 %v359_v3, %v358_v2  ;;  %s330_s8 = scalar_lea.vmem %s1766_s4, %s1085_s30  ;;  %v342_v11 = vld [vmem:[%s1569_s26 + $0x8] sm:$0xff]  ;;  %v576_v16 = vld [vmem:[%s1585_s11 + $0x10] sm:$0xff]  ;;  %s1645_s14 = scalar_lea.vmem %s1765_s3, %s1561_s22  ;;  %v362_v2 = vsub.s32 0, %v1563_v1 }
  0x13   : > { %1197 = vmatprep.mubr.msk.f32.mxu0 %vm364_vm0, %v341_v6  ;;  %v1587_v8 = vld [vmem:[%s330_s8] sm:$0x7]  ;;  %v575_v14 = vld [vmem:[%s1585_s11 + $0x8] sm:$0xff]  ;;  %v577_v17 = vld [vmem:[%s1585_s11 + $0x18] sm:$0xff]  ;;  %s1703_s17 = scalar_lea.vmem %s1767_s5, %s1561_s22 }
  0x14   : > { %1334 = vmatprep.subr.bf16.mxu0 %v1333_v7  ;;  %v1590_v9 = vrot.slane %v1587_v8, %v592_v4  ;;  %v1593_v10 = vrot.slane %v1587_v8, %v773_v5  ;;  %v574_v13 = vld [vmem:[%s1585_s11] sm:$0xff]  ;;  %v344_v18 = vld [vmem:[%s1569_s26 + $0x18] sm:$0xff]  ;;  %v1341_v19 = vpack.c.bf16 %v577_v17, %v576_v16  ;;  %v579_v21 = vld [vmem:[%s1585_s11 + $0x28] sm:$0xff]  ;;  %v1659_v3 = vrot.slane %v1587_v8, %v362_v2 }
  0x15   : > { %1336 = vmatpush3.bf16.msra.mxu0 %v1333_v7  ;;  %v1337_v15 = vpack.c.bf16 %v575_v14, %v574_v13  ;;  %v578_v20 = vld [vmem:[%s1585_s11 + $0x20] sm:$0xff]  ;;  %v346_v24 = vld [vmem:[%s1569_s26 + $0x28] sm:$0xff]  ;;  %v580_v25 = vld [vmem:[%s1585_s11 + $0x30] sm:$0xff] }
  0x16   : > { %v345_v22 = vld [vmem:[%s1569_s26 + $0x20] sm:$0xff]  ;;  %v1345_v23 = vpack.c.bf16 %v579_v21, %v578_v20  ;;  %v581_v26 = vld [vmem:[%s1585_s11 + $0x38] sm:$0xff]  ;;  %v347_v27 = vld [vmem:[%s1569_s26 + $0x30] sm:$0xff] }
  0x17   : > { %1338 = vmatprep.subr.bf16.mxu1 %v1337_v15  ;;  %v1349_v28 = vpack.c.bf16 %v581_v26, %v580_v25  ;;  %v348_v29 = vld [vmem:[%s1569_s26 + $0x38] sm:$0xff]  ;;  %v349_v30 = vld [vmem:[%s1569_s26 + $0x40] sm:$0xff]  ;;  %v350_v31 = vld [vmem:[%s1569_s26 + $0x48] sm:$0xff] }
  0x18   : > { %1198 = vmatmul.mubr.msk.f32.vlgmr.msra.gmra.mrb[0].mxu0 %vm364_vm0, %v342_v11  ;;  %1340 = vmatpush3.bf16.msra.mxu1 %v1337_v15  ;;  %v351_v32 = vld [vmem:[%s1569_s26 + $0x50] sm:$0xff]  ;;  %v352_v33 = vld [vmem:[%s1569_s26 + $0x58] sm:$0xff]  ;;  %v353_v34 = vld [vmem:[%s1569_s26 + $0x60] sm:$0xff] }
  0x19   : > { %1200 = vmatprep.mubr.msk.f32.mxu0 %vm364_vm0, %v343_v12  ;;  %1342 = vmatprep.subr.bf16.mxu1 %v1341_v19  ;;  %v354_v35 = vld [vmem:[%s1569_s26 + $0x68] sm:$0xff]  ;;  %v355_v36 = vld [vmem:[%s1569_s26 + $0x70] sm:$0xff]  ;;  %v356_v37 = vld [vmem:[%s1569_s26 + $0x78] sm:$0xff] }
  0x1a   : > { %v582_v38 = vld [vmem:[%s1585_s11 + $0x40] sm:$0xff]  ;;  %v583_v39 = vld [vmem:[%s1585_s11 + $0x48] sm:$0xff]  ;;  %v584_v41 = vld [vmem:[%s1585_s11 + $0x50] sm:$0xff] }
  0x1b   : > { %v1353_v40 = vpack.c.bf16 %v583_v39, %v582_v38  ;;  %v585_v42 = vld [vmem:[%s1585_s11 + $0x58] sm:$0xff]  ;;  %v586_v44 = vld [vmem:[%s1585_s11 + $0x60] sm:$0xff]  ;;  %v587_v45 = vld [vmem:[%s1585_s11 + $0x68] sm:$0xff] }
  0x1c   : > { %1201 = vmatmul.mubr.msk.f32.gmra.mrb[2].mxu0 %vm364_vm0, %v344_v18  ;;  %1344 = vmatpush3.bf16.msra.mxu1 %v1341_v19  ;;  %v1357_v43 = vpack.c.bf16 %v585_v42, %v584_v41  ;;  %v1361_v46 = vpack.c.bf16 %v587_v45, %v586_v44  ;;  %v588_v47 = vld [vmem:[%s1585_s11 + $0x70] sm:$0xff]  ;;  %v589_v48 = vld [vmem:[%s1585_s11 + $0x78] sm:$0xff]  ;;  %v755_v50 = vld [vmem:[%s1645_s14] sm:$0xff] }
  0x1d   : > { %1203 = vmatprep.mubr.msk.f32.mxu0 %vm364_vm0, %v345_v22  ;;  %1346 = vmatprep.subr.bf16.mxu1 %v1345_v23  ;;  %v1365_v49 = vpack.c.bf16 %v589_v48, %v588_v47  ;;  %v756_v51 = vld [vmem:[%s1645_s14 + $0x8] sm:$0xff]  ;;  %v757_v52 = vld [vmem:[%s1645_s14 + $0x10] sm:$0xff]  ;;  %v758_v54 = vld [vmem:[%s1645_s14 + $0x18] sm:$0xff] }
  0x1e   : > { %v1369_v53 = vpack.c.bf16 %v756_v51, %v755_v50  ;;  %v1373_v55 = vpack.c.bf16 %v758_v54, %v757_v52  ;;  %v759_v56 = vld [vmem:[%s1645_s14 + $0x20] sm:$0xff]  ;;  %v760_v57 = vld [vmem:[%s1645_s14 + $0x28] sm:$0xff]  ;;  %v761_v59 = vld [vmem:[%s1645_s14 + $0x30] sm:$0xff] }
  0x1f   : > { %v1377_v58 = vpack.c.bf16 %v760_v57, %v759_v56  ;;  %v762_v60 = vld [vmem:[%s1645_s14 + $0x38] sm:$0xff]  ;;  %v763_v62 = vld [vmem:[%s1645_s14 + $0x40] sm:$0xff]  ;;  %v764_v63 = vld [vmem:[%s1645_s14 + $0x48] sm:$0xff] }
  0x20   : > { %1204 = vmatmul.mubr.msk.f32.gmra.mrb[4].mxu0 %vm364_vm0, %v346_v24  ;;  %1348 = vmatpush3.bf16.msra.mxu1 %v1345_v23  ;;  %v1381_v61 = vpack.c.bf16 %v762_v60, %v761_v59  ;;  %v1385_v0 = vpack.c.bf16 %v764_v63, %v763_v62  ;;  %v766_v54 = vld [vmem:[%s1645_s14 + $0x58] sm:$0xff]  ;;  %v767_v56 = vld [vmem:[%s1645_s14 + $0x60] sm:$0xff]  ;;  %v768_v57 = vld [vmem:[%s1645_s14 + $0x68] sm:$0xff] }
  0x21   : > { %1206 = vmatprep.mubr.msk.f32.mxu0 %vm364_vm0, %v347_v27  ;;  %1350 = vmatprep.subr.bf16.mxu1 %v1349_v28  ;;  %v769_v59 = vld [vmem:[%s1645_s14 + $0x70] sm:$0xff]  ;;  %v770_v60 = vld [vmem:[%s1645_s14 + $0x78] sm:$0xff] }
  0x22   : > { %1370 = vmatprep.subr.bf16.mxu0 %v1369_v53 }
  0x23   : > { %1372 = vmatpush3.bf16.msra.mxu0 %v1369_v53  ;;  %v765_v53 = vld [vmem:[%s1645_s14 + $0x50] sm:$0xff] }
  0x24   : > { %1207 = vmatmul.mubr.msk.f32.gmra.mrb[6].mxu0 %vm364_vm0, %v348_v29  ;;  %1352 = vmatpush3.bf16.msra.mxu1 %v1349_v28 }
  0x25   : > { %1209 = vmatprep.mubr.msk.f32.mxu0 %vm364_vm0, %v349_v30  ;;  %1354 = vmatprep.subr.bf16.mxu1 %v1353_v40 }
  0x26   : > { %1374 = vmatprep.subr.bf16.mxu0 %v1373_v55 }
  0x27   : > { %1376 = vmatpush3.bf16.msra.mxu0 %v1373_v55  ;;  %v1389_v55 = vpack.c.bf16 %v766_v54, %v765_v53 }
  0x28   : > { %1210 = vmatmul.mubr.msk.f32.gmra.mrb[8].mxu0 %vm364_vm0, %v350_v31  ;;  %1356 = vmatpush3.bf16.msra.mxu1 %v1353_v40 }
  0x29   : > { %1212 = vmatprep.mubr.msk.f32.mxu0 %vm364_vm0, %v351_v32  ;;  %1358 = vmatprep.subr.bf16.mxu1 %v1357_v43 }
  0x2a   : > { %1378 = vmatprep.subr.bf16.mxu0 %v1377_v58 }
  0x2b   : > { %1380 = vmatpush3.bf16.msra.mxu0 %v1377_v58  ;;  %v1393_v58 = vpack.c.bf16 %v768_v57, %v767_v56 }
  0x2c   : > { %1213 = vmatmul.mubr.msk.f32.gmra.mrb[10].mxu0 %vm364_vm0, %v352_v33  ;;  %1360 = vmatpush3.bf16.msra.mxu1 %v1357_v43 }
  0x2d   : > { %1215 = vmatprep.mubr.msk.f32.mxu0 %vm364_vm0, %v353_v34  ;;  %1362 = vmatprep.subr.bf16.mxu1 %v1361_v46 }
  0x2e   : > { %1382 = vmatprep.subr.bf16.mxu0 %v1381_v61 }
  0x2f   : > { %1384 = vmatpush3.bf16.msra.mxu0 %v1381_v61  ;;  %v1397_v61 = vpack.c.bf16 %v770_v60, %v769_v59 }
  0x30   : > { %1216 = vmatmul.mubr.msk.f32.gmra.mrb[12].mxu0 %vm364_vm0, %v354_v35  ;;  %1364 = vmatpush3.bf16.msra.mxu1 %v1361_v46 }
  0x31   : > { %1218 = vmatprep.mubr.msk.f32.mxu0 %vm364_vm0, %v355_v36  ;;  %1366 = vmatprep.subr.bf16.mxu1 %v1365_v49 }
  0x32   : > { %1386 = vmatprep.subr.bf16.mxu0 %v1385_v0 }
  0x33   : > { %1388 = vmatpush3.bf16.msra.mxu0 %v1385_v0 }
  0x34   : > { %1219 = vmatmul.mubr.msk.f32.gmra.mrb[14].mxu0 %vm364_vm0, %v356_v37  ;;  %1368 = vmatpush3.bf16.msra.mxu1 %v1365_v49 }
  0x35   : > { %1390 = vmatprep.subr.bf16.mxu0 %v1389_v55 }
  0x37   : > { %1392 = vmatpush3.bf16.msra.mxu0 %v1389_v55 }
  0x38   : > { %1394 = vmatprep.subr.bf16.mxu0 %v1393_v58 }
  0x3b   : > { %1396 = vmatpush3.bf16.msra.mxu0 %v1393_v58 }
  0x3c   : > { %1398 = vmatprep.subr.bf16.mxu0 %v1397_v61 }
  0x3f   : > { %1400 = vmatpush3.bf16.msra.mxu0 %v1397_v61 }
  0xeb   : > { %v1199_v4 = vpop.f32.mrb[0].mxu0 }
  0xec   : > { %v485_v5 = vadd.f32 %v1199_v4, %v1659_v3  ;;  %v479_v6 = vpop.f32.mrb[1].mxu0 }
  0xed   : > { %v480_v7 = vadd.f32 %v479_v6, %v1659_v3 }
  0xef   : > { %1425 = vtanh.f32 %v480_v7  ;;  %v1202_v11 = vpop.f32.mrb[2].mxu0 }
  0xf0   : > { %1427 = vtanh.f32 %v485_v5  ;;  %v495_v12 = vadd.f32 %v1202_v11, %v1659_v3  ;;  %v489_v13 = vpop.f32.mrb[3].mxu0 }
  0xf1   : > { %v490_v14 = vadd.f32 %v489_v13, %v1659_v3 }
  0xf3   : > { %1429 = vtanh.f32 %v490_v14  ;;  %v1205_v15 = vpop.f32.mrb[4].mxu0 }
  0xf4   : > { %1431 = vtanh.f32 %v495_v12  ;;  %v505_v1 = vadd.f32 %v1205_v15, %v1659_v3  ;;  %v499_v8 = vpop.f32.mrb[5].mxu0 }
  0xf5   : > { %v500_v16 = vadd.f32 %v499_v8, %v1659_v3 }
  0xf7   : > { %1433 = vtanh.f32 %v500_v16  ;;  %v1208_v17 = vpop.f32.mrb[6].mxu0 }
  0xf8   : > { %1435 = vtanh.f32 %v505_v1  ;;  %v515_v18 = vadd.f32 %v1208_v17, %v1659_v3  ;;  %v509_v19 = vpop.f32.mrb[7].mxu0 }
  0xf9   : > { %v1426_v20 = vpop.eup %1425  ;;  %v510_v21 = vadd.f32 %v509_v19, %v1659_v3 }
  0xfa   : > { %v1428_v22 = vpop.eup %1427  ;;  %1253 = vmatprep.mubr.f32.mxu1 %v1426_v20 }
  0xfb   : > { %1437 = vtanh.f32 %v510_v21  ;;  %v1211_v23 = vpop.f32.mrb[8].mxu0  ;;  %1254 = vmatmul.mubr.f32.vlgmr.msra.gmra.mrb[0].mxu1 %v1428_v22 }
  0xfc   : > { %1439 = vtanh.f32 %v515_v18  ;;  %v525_v24 = vadd.f32 %v1211_v23, %v1659_v3  ;;  %v519_v25 = vpop.f32.mrb[9].mxu0 }
  0xfd   : > { %v1430_v26 = vpop.eup %1429  ;;  %v520_v27 = vadd.f32 %v519_v25, %v1659_v3 }
  0xfe   : > { %v1432_v28 = vpop.eup %1431  ;;  %1256 = vmatprep.mubr.f32.mxu1 %v1430_v26 }
  0xff   : > { %1441 = vtanh.f32 %v520_v27  ;;  %v1214_v29 = vpop.f32.mrb[10].mxu0  ;;  %1257 = vmatmul.mubr.f32.gmra.mrb[2].mxu1 %v1432_v28 }
 0x100   : > { %1443 = vtanh.f32 %v525_v24  ;;  %v535_v30 = vadd.f32 %v1214_v29, %v1659_v3  ;;  %v529_v31 = vpop.f32.mrb[11].mxu0 }
 0x101   : > { %v1434_v32 = vpop.eup %1433  ;;  %v530_v33 = vadd.f32 %v529_v31, %v1659_v3 }
 0x102   : > { %v1436_v34 = vpop.eup %1435  ;;  %1259 = vmatprep.mubr.f32.mxu1 %v1434_v32 }
 0x103   : > { %1445 = vtanh.f32 %v530_v33  ;;  %v1217_v35 = vpop.f32.mrb[12].mxu0  ;;  %1260 = vmatmul.mubr.f32.gmra.mrb[4].mxu1 %v1436_v34 }
 0x104   : > { %1447 = vtanh.f32 %v535_v30  ;;  %v545_v36 = vadd.f32 %v1217_v35, %v1659_v3  ;;  %v539_v37 = vpop.f32.mrb[13].mxu0 }
 0x105   : > { %v1438_v38 = vpop.eup %1437  ;;  %v540_v39 = vadd.f32 %v539_v37, %v1659_v3 }
 0x106   : > { %v1440_v40 = vpop.eup %1439  ;;  %1262 = vmatprep.mubr.f32.mxu1 %v1438_v38 }
 0x107   : > { %1449 = vtanh.f32 %v540_v39  ;;  %v1220_v41 = vpop.f32.mrb[14].mxu0  ;;  %1263 = vmatmul.mubr.f32.gmra.mrb[6].mxu1 %v1440_v40 }
 0x108   : > { %1451 = vtanh.f32 %v545_v36  ;;  %v555_v42 = vadd.f32 %v1220_v41, %v1659_v3  ;;  %v549_v43 = vpop.f32.mrb[15].mxu0 }
 0x109   : > { %v1442_v44 = vpop.eup %1441  ;;  %v550_v45 = vadd.f32 %v549_v43, %v1659_v3 }
 0x10a   : > { %v1444_v46 = vpop.eup %1443  ;;  %1265 = vmatprep.mubr.f32.mxu1 %v1442_v44 }
 0x10b   : > { %1453 = vtanh.f32 %v550_v45  ;;  %1266 = vmatmul.mubr.f32.gmra.mrb[8].mxu1 %v1444_v46 }
 0x10c   : > { %1455 = vtanh.f32 %v555_v42 }
 0x10d   : > { %v1446_v47 = vpop.eup %1445 }
 0x10e   : > { %v1448_v48 = vpop.eup %1447  ;;  %1268 = vmatprep.mubr.f32.mxu1 %v1446_v47 }
 0x10f   : > { %1269 = vmatmul.mubr.f32.gmra.mrb[10].mxu1 %v1448_v48 }
 0x111   : > { %v1450_v49 = vpop.eup %1449 }
 0x112   : > { %v1452_v50 = vpop.eup %1451  ;;  %1271 = vmatprep.mubr.f32.mxu1 %v1450_v49 }
 0x113   : > { %1272 = vmatmul.mubr.f32.gmra.mrb[12].mxu1 %v1452_v50 }
 0x115   : > { %v1454_v51 = vpop.eup %1453 }
 0x116   : > { %v1456_v52 = vpop.eup %1455  ;;  %1274 = vmatprep.mubr.f32.mxu1 %v1454_v51 }
 0x117   : > { %1275 = vmatmul.mubr.f32.gmra.mrb[14].mxu1 %v1456_v52 }
 0x1ce   : > { %v1255_v62 = vpop.f32.mrb[0].mxu1 }
 0x1cf   : > { %v666_v63 = vadd.f32 %v1255_v62, %v1590_v9  ;;  %v660_v0 = vpop.f32.mrb[1].mxu1 }
 0x1d0   : > { %v661_v2 = vadd.f32 %v660_v0, %v1590_v9 }
 0x1d2   : > { %1457 = vtanh.f32 %v661_v2  ;;  %v1258_v3 = vpop.f32.mrb[2].mxu1 }
 0x1d3   : > { %1459 = vtanh.f32 %v666_v63  ;;  %v676_v4 = vadd.f32 %v1258_v3, %v1590_v9  ;;  %v670_v5 = vpop.f32.mrb[3].mxu1 }
 0x1d4   : > { %v671_v6 = vadd.f32 %v670_v5, %v1590_v9 }
 0x1d6   : > { %1461 = vtanh.f32 %v671_v6  ;;  %v1261_v7 = vpop.f32.mrb[4].mxu1 }
 0x1d7   : > { %1463 = vtanh.f32 %v676_v4  ;;  %v686_v11 = vadd.f32 %v1261_v7, %v1590_v9  ;;  %v680_v12 = vpop.f32.mrb[5].mxu1 }
 0x1d8   : > { %v681_v13 = vadd.f32 %v680_v12, %v1590_v9 }
 0x1da   : > { %1465 = vtanh.f32 %v681_v13  ;;  %v1264_v14 = vpop.f32.mrb[6].mxu1 }
 0x1db   : > { %1467 = vtanh.f32 %v686_v11  ;;  %v696_v15 = vadd.f32 %v1264_v14, %v1590_v9  ;;  %v690_v1 = vpop.f32.mrb[7].mxu1 }
 0x1dc   : > { %v1458_v8 = vpop.eup %1457  ;;  %v691_v16 = vadd.f32 %v690_v1, %v1590_v9 }
 0x1dd   : > { %v1460_v17 = vpop.eup %1459  ;;  %1309 = vmatprep.mubr.f32.mxu0 %v1458_v8 }
 0x1de   : > { %1469 = vtanh.f32 %v691_v16  ;;  %v1267_v18 = vpop.f32.mrb[8].mxu1  ;;  %1310 = vmatmul.mubr.f32.vlgmr.msra.gmra.mrb[16].mxu0 %v1460_v17 }
 0x1df   : > { %1471 = vtanh.f32 %v696_v15  ;;  %v706_v19 = vadd.f32 %v1267_v18, %v1590_v9  ;;  %v700_v20 = vpop.f32.mrb[9].mxu1 }
 0x1e0   : > { %v1462_v21 = vpop.eup %1461  ;;  %v701_v22 = vadd.f32 %v700_v20, %v1590_v9 }
 0x1e1   : > { %v1464_v23 = vpop.eup %1463  ;;  %1312 = vmatprep.mubr.f32.mxu0 %v1462_v21 }
 0x1e2   : > { %1473 = vtanh.f32 %v701_v22  ;;  %v1270_v24 = vpop.f32.mrb[10].mxu1  ;;  %1313 = vmatmul.mubr.f32.gmra.mrb[18].mxu0 %v1464_v23 }
 0x1e3   : > { %1475 = vtanh.f32 %v706_v19  ;;  %v716_v25 = vadd.f32 %v1270_v24, %v1590_v9  ;;  %v710_v26 = vpop.f32.mrb[11].mxu1 }
 0x1e4   : > { %v1466_v27 = vpop.eup %1465  ;;  %v711_v28 = vadd.f32 %v710_v26, %v1590_v9 }
 0x1e5   : > { %v1468_v29 = vpop.eup %1467  ;;  %1315 = vmatprep.mubr.f32.mxu0 %v1466_v27 }
 0x1e6   : > { %1477 = vtanh.f32 %v711_v28  ;;  %v1273_v30 = vpop.f32.mrb[12].mxu1  ;;  %1316 = vmatmul.mubr.f32.gmra.mrb[20].mxu0 %v1468_v29 }
 0x1e7   : > { %1479 = vtanh.f32 %v716_v25  ;;  %v726_v31 = vadd.f32 %v1273_v30, %v1590_v9  ;;  %v720_v32 = vpop.f32.mrb[13].mxu1 }
 0x1e8   : > { %v1470_v33 = vpop.eup %1469  ;;  %v721_v34 = vadd.f32 %v720_v32, %v1590_v9 }
 0x1e9   : > { %v1472_v35 = vpop.eup %1471  ;;  %1318 = vmatprep.mubr.f32.mxu0 %v1470_v33 }
 0x1ea   : > { %1481 = vtanh.f32 %v721_v34  ;;  %v1276_v36 = vpop.f32.mrb[14].mxu1  ;;  %1319 = vmatmul.mubr.f32.gmra.mrb[22].mxu0 %v1472_v35 }
 0x1eb   : > { %1483 = vtanh.f32 %v726_v31  ;;  %v736_v37 = vadd.f32 %v1276_v36, %v1590_v9  ;;  %v730_v38 = vpop.f32.mrb[15].mxu1 }
 0x1ec   : > { %v1474_v39 = vpop.eup %1473  ;;  %v731_v40 = vadd.f32 %v730_v38, %v1590_v9 }
 0x1ed   : > { %v1476_v41 = vpop.eup %1475  ;;  %1321 = vmatprep.mubr.f32.mxu0 %v1474_v39 }
 0x1ee   : > { %1485 = vtanh.f32 %v731_v40  ;;  %1322 = vmatmul.mubr.f32.gmra.mrb[24].mxu0 %v1476_v41 }
 0x1ef   : > { %1487 = vtanh.f32 %v736_v37 }
 0x1f0   : > { %v1478_v42 = vpop.eup %1477 }
 0x1f1   : > { %v1480_v43 = vpop.eup %1479  ;;  %1324 = vmatprep.mubr.f32.mxu0 %v1478_v42 }
 0x1f2   : > { %1325 = vmatmul.mubr.f32.gmra.mrb[26].mxu0 %v1480_v43 }
 0x1f4   : > { %v1482_v44 = vpop.eup %1481 }
 0x1f5   : > { %v1484_v45 = vpop.eup %1483  ;;  %1327 = vmatprep.mubr.f32.mxu0 %v1482_v44 }
 0x1f6   : > { %1328 = vmatmul.mubr.f32.gmra.mrb[28].mxu0 %v1484_v45 }
 0x1f8   : > { %v1486_v46 = vpop.eup %1485 }
 0x1f9   : > { %v1488_v47 = vpop.eup %1487  ;;  %1330 = vmatprep.mubr.f32.mxu0 %v1486_v46 }
 0x1fa   : > { %1331 = vmatmul.mubr.f32.gmra.mrb[30].mxu0 %v1488_v47 }
 0x2b1   : > { %v1311_v9 = vpop.f32.mrb[16].mxu0 }
 0x2b2   : > { %v847_v48 = vadd.f32 %v1311_v9, %v1593_v10  ;;  %v841_v49 = vpop.f32.mrb[17].mxu0 }
 0x2b3   : > { %v842_v50 = vadd.f32 %v841_v49, %v1593_v10 }
 0x2b4   : > { %922 = vst.msk [vmem:[%s1703_s17 + $0x8] sm:$0xff] %vm920_vm1, %v847_v48 }
 0x2b5   : > { %921 = vst.msk [vmem:[%s1703_s17] sm:$0xff] %vm920_vm1, %v842_v50  ;;  %v1314_v51 = vpop.f32.mrb[18].mxu0 }
 0x2b6   : > { %v857_v52 = vadd.f32 %v1314_v51, %v1593_v10  ;;  %v851_v53 = vpop.f32.mrb[19].mxu0 }
 0x2b7   : > { %v852_v54 = vadd.f32 %v851_v53, %v1593_v10 }
 0x2b8   : > { %924 = vst.msk [vmem:[%s1703_s17 + $0x18] sm:$0xff] %vm920_vm1, %v857_v52 }
 0x2b9   : > { %923 = vst.msk [vmem:[%s1703_s17 + $0x10] sm:$0xff] %vm920_vm1, %v852_v54  ;;  %v1317_v55 = vpop.f32.mrb[20].mxu0 }
 0x2ba   : > { %v867_v56 = vadd.f32 %v1317_v55, %v1593_v10  ;;  %v861_v57 = vpop.f32.mrb[21].mxu0 }
 0x2bb   : > { %v862_v58 = vadd.f32 %v861_v57, %v1593_v10 }
 0x2bc   : > { %926 = vst.msk [vmem:[%s1703_s17 + $0x28] sm:$0xff] %vm920_vm1, %v867_v56 }
 0x2bd   : > { %925 = vst.msk [vmem:[%s1703_s17 + $0x20] sm:$0xff] %vm920_vm1, %v862_v58  ;;  %v1320_v59 = vpop.f32.mrb[22].mxu0 }
 0x2be   : > { %v877_v60 = vadd.f32 %v1320_v59, %v1593_v10  ;;  %v871_v61 = vpop.f32.mrb[23].mxu0 }
 0x2bf   : > { %v872_v62 = vadd.f32 %v871_v61, %v1593_v10 }
 0x2c0   : > { %928 = vst.msk [vmem:[%s1703_s17 + $0x38] sm:$0xff] %vm920_vm1, %v877_v60 }
 0x2c1   : > { %927 = vst.msk [vmem:[%s1703_s17 + $0x30] sm:$0xff] %vm920_vm1, %v872_v62  ;;  %v1323_v63 = vpop.f32.mrb[24].mxu0 }
 0x2c2   : > { %v887_v0 = vadd.f32 %v1323_v63, %v1593_v10  ;;  %v881_v2 = vpop.f32.mrb[25].mxu0 }
 0x2c3   : > { %v882_v3 = vadd.f32 %v881_v2, %v1593_v10 }
 0x2c4   : > { %930 = vst.msk [vmem:[%s1703_s17 + $0x48] sm:$0xff] %vm920_vm1, %v887_v0 }
 0x2c5   : > { %929 = vst.msk [vmem:[%s1703_s17 + $0x40] sm:$0xff] %vm920_vm1, %v882_v3  ;;  %v1326_v4 = vpop.f32.mrb[26].mxu0 }
 0x2c6   : > { %v897_v5 = vadd.f32 %v1326_v4, %v1593_v10  ;;  %v891_v6 = vpop.f32.mrb[27].mxu0 }
 0x2c7   : > { %v892_v7 = vadd.f32 %v891_v6, %v1593_v10 }
 0x2c8   : > { %932 = vst.msk [vmem:[%s1703_s17 + $0x58] sm:$0xff] %vm920_vm1, %v897_v5 }
 0x2c9   : > { %931 = vst.msk [vmem:[%s1703_s17 + $0x50] sm:$0xff] %vm920_vm1, %v892_v7  ;;  %v1329_v11 = vpop.f32.mrb[28].mxu0 }
 0x2ca   : > { %v907_v12 = vadd.f32 %v1329_v11, %v1593_v10  ;;  %v901_v13 = vpop.f32.mrb[29].mxu0 }
 0x2cb   : > { %v902_v14 = vadd.f32 %v901_v13, %v1593_v10 }
 0x2cc   : > { %934 = vst.msk [vmem:[%s1703_s17 + $0x68] sm:$0xff] %vm920_vm1, %v907_v12 }
 0x2cd   : > { %933 = vst.msk [vmem:[%s1703_s17 + $0x60] sm:$0xff] %vm920_vm1, %v902_v14  ;;  %v1332_v15 = vpop.f32.mrb[30].mxu0 }
 0x2ce   : > { %v917_v1 = vadd.f32 %v1332_v15, %v1593_v10  ;;  %v911_v8 = vpop.f32.mrb[31].mxu0 }
 0x2cf   : > { %v912_v16 = vadd.f32 %v911_v8, %v1593_v10 }
 0x2d0   : > { %936 = vst.msk [vmem:[%s1703_s17 + $0x78] sm:$0xff] %vm920_vm1, %v917_v1 }
 0x2d1   : > { %935 = vst.msk [vmem:[%s1703_s17 + $0x70] sm:$0xff] %vm920_vm1, %v912_v16 }
 0x2d2 PF: > { %s15_s20 = sadd.s32 1, %s1511_s20   ;;  %s1768_s18 = smov %s1507_s19 }
 0x2d3   : > { %p12_p5 = scmp.ge.s32.totalorder %s15_s20, 6   ;;  %s1769_s19 = smov %s1771_s21 }
 0x2d5   :  { %14 = sbr.rel (!%p12_p5) target bundleno = 2 (0x2), region = 82 }

</bundles_post_ra>
